<compile_context>
chip_gen: v7x
topology: tpu7x:2x2x1
jax: 0.10.0
libtpu: 0.0.40
codegen_flags: <defaults>
</compile_context>

<pallas_src>
import jax
import jax.numpy as jnp
from jax.experimental import pallas as pl
from jax.experimental.pallas import tpu as pltpu


def _dma_identity_kernel(x_hbm_ref, o_hbm_ref, sem):
    # Single whole-array HBM->HBM DMA: the DMA engine does the copy, the
    # TensorCore only issues/waits on it.
    cp = pltpu.make_async_copy(x_hbm_ref, o_hbm_ref, sem)
    cp.start()
    cp.wait()


def _marker_copy(x):
    """Materialize a distinct buffer holding a bit-exact copy of `x`."""
    x = jnp.asarray(x)
    orig_shape = x.shape
    # Promote 0-D / 1-D to 2-D for the copy; since the DMA moves the whole
    # array in one shot, no tiling/lane constraints apply.
    if x.ndim == 0:
        x2d = x.reshape(1, 1)
    elif x.ndim == 1:
        x2d = x.reshape(1, x.shape[0])
    else:
        x2d = x
    y = pl.pallas_call(
        _dma_identity_kernel,
        out_shape=jax.ShapeDtypeStruct(x2d.shape, x2d.dtype),
        in_specs=[pl.BlockSpec(memory_space=pl.ANY)],
        out_specs=pl.BlockSpec(memory_space=pl.ANY),
        scratch_shapes=[pltpu.SemaphoreType.DMA(())],
    )(x2d)
    return y.reshape(orig_shape)


def module_marker_start(*args, materialize=False):
    """JAX/Pallas equivalent of ModuleMarkerStartWrapper.forward(*args).

    The Neuron marker is a semantic identity.  By default the inputs are
    returned untouched behind an optimization_barrier (boundary hint, no HBM
    traffic).  Set materialize=True to force a physical copy of each tensor
    via a single HBM->HBM DMA.

    Returns a single tensor if one arg is given, else a tuple of tensors,
    matching the Neuron CustomCall output-type construction.
    """
    # TODO(synk): the Neuron-specific AwsNeuronModuleMarkerStartForward
    # CustomCall annotation has no TPU equivalent; only the identity data
    # semantics (plus an optimization barrier as a boundary hint) are kept.
    if materialize:
        outs = tuple(_marker_copy(a) for a in args)
    else:
        outs = jax.lax.optimization_barrier(
            tuple(jnp.asarray(a) for a in args)
        )
    if len(outs) == 1:
        return outs[0]
    return tuple(outs)


if __name__ == "__main__":
    key = jax.random.PRNGKey(0)
    k1, k2 = jax.random.split(key)

    # Small shapes: an NCHW conv-style activation and a (B, S, H) tensor.
    x = jax.random.normal(k1, (2, 4, 16, 16), dtype=jnp.float32)   # NCHW
    h = jax.random.normal(k2, (2, 8, 32), dtype=jnp.bfloat16)      # (B, S, H)

    # Fast path: marker is a no-op (single-arg -> tensor, multi-arg -> tuple).
    y = module_marker_start(x)
    y_multi = module_marker_start(x, h)

    # Materialized path: exercises the Pallas HBM->HBM DMA copy kernel.
    y_copy = module_marker_start(x, materialize=True)
    y_multi_copy = module_marker_start(x, h, materialize=True)

    jax.block_until_ready((y, y_multi, y_copy, y_multi_copy))

    # Fast-path checks.
    assert y.shape == x.shape and y.dtype == x.dtype
    assert jnp.array_equal(y, x)
    assert isinstance(y_multi, tuple) and len(y_multi) == 2
    assert jnp.array_equal(y_multi[0], x)
    assert y_multi[1].dtype == h.dtype
    assert jnp.array_equal(y_multi[1].astype(jnp.float32),
                           h.astype(jnp.float32))

    # Materialized-path checks (bit-exact copy, distinct buffers).
    assert y_copy.shape == x.shape and y_copy.dtype == x.dtype
    assert jnp.array_equal(y_copy, x)
    assert isinstance(y_multi_copy, tuple) and len(y_multi_copy) == 2
    assert jnp.array_equal(y_multi_copy[0], x)
    assert y_multi_copy[1].dtype == h.dtype
    assert jnp.array_equal(y_multi_copy[1].astype(jnp.float32),
                           h.astype(jnp.float32))

    print("KERNEL_OK")
</pallas_src>

<mosaic_0001>
module attributes {stable_mosaic.version = 11 : i64} {
  func.func @_dma_identity_kernel(%arg0: memref<2x4x16x16xf32, #tpu.memory_space<any>>, %arg1: memref<2x4x16x16xf32, #tpu.memory_space<any>>, %arg2: memref<!tpu.dma_semaphore, #tpu.memory_space<semaphore_mem>>) attributes {dimension_semantics = [], scalar_prefetch = 0 : i64, scratch_operands = 1 : i64, tpu.core_type = #tpu.core_type<tc>} {
    tpu.enqueue_dma source(%arg0 : memref<2x4x16x16xf32, #tpu.memory_space<any>>) target(%arg1 : memref<2x4x16x16xf32, #tpu.memory_space<any>>) target_semaphore(%arg2 : memref<!tpu.dma_semaphore, #tpu.memory_space<semaphore_mem>>)
    tpu.wait_dma2 semaphore(%arg2 : memref<!tpu.dma_semaphore, #tpu.memory_space<semaphore_mem>>) src(%arg0 : memref<2x4x16x16xf32, #tpu.memory_space<any>>) dst(%arg1 : memref<2x4x16x16xf32, #tpu.memory_space<any>>)
    return
  }
}

</mosaic_0001>

<bundles_post_ra>
// kernel: tpu_custom_call.1
= control target key start
LH: loop header
LB: loop body
LE: loop exit
PB: predicated region body
PF: predicated region fallthrough
CT: control target
= control target key end

     0   :  { %s36_s6 = smov [#allocation2]   ;;  %s37_s7 = smov [#allocation3]   ;;  %s55_s0 = inlined_call_operand.hbm [shape: f32[2,4,16,16], index: 0, kind: input, shape index: {}]   ;;  %s56_s1 = inlined_call_operand.hbm [shape: f32[2,4,16,16], index: 1, kind: output, shape index: {}]  }
   0x1   :  { %s38_s8 = smov 0  }
   0x2   :  { %18 = dma.general %s55_s0, 2048, %s56_s1, %s36_s6, %s37_s7, [#allocation4], %s38_s8, 0  }
   0x3   :  { %34 = dma.done.wait [#allocation2], 2048 }
   0x4   :  { %35 = vsyncadd [#allocation2], 4294965248 }
   0x5   :  { %24 = vsyncmov [#allocation2] }
   0x8   :  { %s25_s13 = vpop.sfrf %24 }
   0x9   :  { %p30_p0 = scmp.ne.s32.totalorder %s25_s13, 0 }
   0xb   :  { %29 = shalt.err (%p30_p0)  }

</bundles_post_ra>
